<compile_context>
chip_gen: v5e
topology: v5e:2x2
jax: 0.10.0
libtpu: 0.0.40
codegen_flags: <defaults>
</compile_context>

<pallas_src>
import functools

import jax
import jax.numpy as jnp
from jax import lax
from jax.experimental import pallas as pl
from jax.experimental.pallas import tpu as pltpu

LANE = 128


def _round_up(x, m):
    return ((x + m - 1) // m) * m


# --------------------------- generic linear kernel -------------------------- #

def _linear_kernel(x_ref, w_ref, b_ref, o_ref):
    acc = jnp.dot(x_ref[...], w_ref[...], preferred_element_type=jnp.float32)
    o_ref[...] = (acc + b_ref[...]).astype(o_ref.dtype)


def pallas_linear(x, w, b, *, tile_rows=128, out_dtype=jnp.float32):
    """x:(n,k) bf16, w:(k,m) bf16 (m multiple of 128), b:(1,m) f32 -> (n,m)."""
    n, k = x.shape
    m = w.shape[1]
    n_pad = _round_up(max(n, tile_rows), tile_rows)
    if n_pad != n:
        x = jnp.pad(x, ((0, n_pad - n), (0, 0)))
    out = pl.pallas_call(
        _linear_kernel,
        out_shape=jax.ShapeDtypeStruct((n_pad, m), out_dtype),
        grid_spec=pltpu.PrefetchScalarGridSpec(
            num_scalar_prefetch=0,
            grid=(n_pad // tile_rows,),
            in_specs=[
                pl.BlockSpec((tile_rows, k), lambda i: (i, 0)),
                pl.BlockSpec((k, m), lambda i: (0, 0)),
                pl.BlockSpec((1, m), lambda i: (0, 0)),
            ],
            out_specs=pl.BlockSpec((tile_rows, m), lambda i: (i, 0)),
        ),
        compiler_params=pltpu.CompilerParams(dimension_semantics=("parallel",)),
    )(x, w, b)
    return out[:n]


# ----------------------- fused LIIF query / imnet kernel -------------------- #

def _liif_query_kernel(x_ref, meta_ref, w0r_ref, b0_ref, w1_ref, b1_ref,
                       w2_ref, b2_ref, o_ref, *, ngroups, hid):
    t, p = x_ref.shape
    meta = meta_ref[...]                                  # (t, 3*ng + 2) f32
    # lane-group id: lanes [g*hid:(g+1)*hid] belong to local-ensemble branch g
    g = lax.broadcasted_iota(jnp.int32, (t, p), 1) // hid

    def expand(base):
        # broadcast per-branch scalars (one column per branch) into their 64-lane slot
        out = jnp.zeros((t, p), jnp.float32)
        for b in range(ngroups):
            out = jnp.where(g == b, meta[:, base + b:base + b + 1], out)
        return out

    rely = expand(0)
    relx = expand(ngroups)
    wgt = expand(2 * ngroups)
    cell_h = meta[:, 3 * ngroups:3 * ngroups + 1]
    cell_w = meta[:, 3 * ngroups + 1:3 * ngroups + 2]

    w0r = w0r_ref[...]                                    # (4, p) f32, lane-tiled rows
    # imnet layer 0: pre-gathered (feat @ W0[:Cu]) + f32 rel/cell contribution
    h0 = (x_ref[...].astype(jnp.float32)
          + rely * w0r[0:1, :] + relx * w0r[1:2, :]
          + cell_h * w0r[2:3, :] + cell_w * w0r[3:4, :]
          + b0_ref[...])
    h0 = jnp.maximum(h0, 0.0).astype(jnp.bfloat16)
    # layer 1: single block-diagonal matmul covering all branches
    h1 = jnp.dot(h0, w1_ref[...], preferred_element_type=jnp.float32) + b1_ref[...]
    h1 = jnp.maximum(h1, 0.0)
    # area-weighted ensemble combine BEFORE layer 2 (weights sum to 1)
    h1w = (h1 * wgt).astype(jnp.bfloat16)
    o_ref[...] = (jnp.dot(h1w, w2_ref[...], preferred_element_type=jnp.float32)
                  + b2_ref[...])                          # lane-dense (t, 128) store


def pallas_liif_query(x, meta, w0r, b0, w1, b1, w2, b2, *, ngroups, hid,
                      tile_rows=256, out_dim=3):
    n, p = x.shape
    assert p == ngroups * hid and p % LANE == 0
    meta_w = meta.shape[1]
    out_pad = w2.shape[1]
    n_pad = _round_up(max(n, tile_rows), tile_rows)
    if n_pad != n:                       # ragged query counts: pad, slice after
        x = jnp.pad(x, ((0, n_pad - n), (0, 0)))
        meta = jnp.pad(meta, ((0, n_pad - n), (0, 0)))
    kernel = functools.partial(_liif_query_kernel, ngroups=ngroups, hid=hid)
    out = pl.pallas_call(
        kernel,
        out_shape=jax.ShapeDtypeStruct((n_pad, out_pad), jnp.float32),
        grid_spec=pltpu.PrefetchScalarGridSpec(
            num_scalar_prefetch=0,
            grid=(n_pad // tile_rows,),
            in_specs=[
                pl.BlockSpec((tile_rows, p), lambda i: (i, 0)),        # packed feat@W0
                pl.BlockSpec((tile_rows, meta_w), lambda i: (i, 0)),   # merged meta
                pl.BlockSpec((4, p), lambda i: (0, 0)),                # W0 rel rows (f32)
                pl.BlockSpec((1, p), lambda i: (0, 0)),                # b0 (tiled)
                pl.BlockSpec((p, p), lambda i: (0, 0)),                # W1 block-diag
                pl.BlockSpec((1, p), lambda i: (0, 0)),                # b1 (tiled)
                pl.BlockSpec((p, out_pad), lambda i: (0, 0)),          # W2 stacked
                pl.BlockSpec((1, out_pad), lambda i: (0, 0)),          # b2 (padded)
            ],
            out_specs=pl.BlockSpec((tile_rows, out_pad), lambda i: (i, 0)),
        ),
        compiler_params=pltpu.CompilerParams(dimension_semantics=("parallel",)),
    )(x, meta, w0r, b0, w1, b1, w2, b2)
    return out[:n, :out_dim]


# --------------------------------- JAX glue --------------------------------- #

def unfold3x3(feat):
    # F.unfold(feat, 3, padding=1).view(B, C*9, H, W); channel index = c*9 + ki*3 + kj.
    B, C, H, W = feat.shape
    fp = jnp.pad(feat, ((0, 0), (0, 0), (1, 1), (1, 1)))
    patches = jnp.stack(
        [fp[:, :, ki:ki + H, kj:kj + W] for ki in range(3) for kj in range(3)], axis=2)
    return patches.reshape(B, C * 9, H, W)


def conv3x3_encoder(x, w_pad, b_pad, c_out):
    # 3x3 conv (padding=1) via im2col + a tiny Pallas matmul, bf16 output.
    B, Cin, H, W = x.shape
    patches = unfold3x3(x).transpose(0, 2, 3, 1).reshape(B * H * W, Cin * 9)
    out = pallas_linear(patches.astype(jnp.bfloat16), w_pad, b_pad,
                        tile_rows=128, out_dtype=jnp.bfloat16)
    return out[:, :c_out].reshape(B, H, W, c_out).transpose(0, 3, 1, 2)


def prepare_liif_params(raw, local_ensemble=True, feat_unfold=True, cell_decode=True):
    """Pack the logical weights into TPU-friendly lane-packed / block-diag layouts."""
    enc_w, enc_b = raw["enc_w"], raw["enc_b"]
    w0, b0, w1, b1, w2, b2 = raw["imnet"]
    cf = enc_w.shape[1]
    cu = cf * 9 if feat_unfold else cf
    hid = w0.shape[1]
    out_dim = w2.shape[1]
    nb = 4 if local_ensemble else 1
    ngroups = nb
    while (ngroups * hid) % LANE:        # pad with zero-weight branches for lane alignment
        ngroups += 1
    p = ngroups * hid
    cf_pad = _round_up(max(cf, LANE), LANE)
    hid_pad = _round_up(max(hid, LANE), LANE)
    out_pad = _round_up(max(out_dim, LANE), LANE)

    enc_w_p = jnp.zeros((enc_w.shape[0], cf_pad), jnp.float32).at[:, :cf].set(enc_w)
    enc_b_p = jnp.zeros((1, cf_pad), jnp.float32).at[:, :cf].set(enc_b)
    w0_feat = jnp.zeros((cu, hid_pad), jnp.float32).at[:, :hid].set(w0[:cu])

    # rel_coord / rel_cell rows of imnet layer 0, tiled across branch lane-slots (f32)
    w0rel = jnp.zeros((4, p), jnp.float32)
    w0rel = w0rel.at[0].set(jnp.tile(w0[cu + 0], ngroups))
    w0rel = w0rel.at[1].set(jnp.tile(w0[cu + 1], ngroups))
    if cell_decode:
        w0rel = w0rel.at[2].set(jnp.tile(w0[cu + 2], ngroups))
        w0rel = w0rel.at[3].set(jnp.tile(w0[cu + 3], ngroups))
    b0p = jnp.tile(b0.reshape(1, hid), (1, ngroups))
    b1p = jnp.tile(b1.reshape(1, hid), (1, ngroups))
    w1p = jnp.zeros((p, p), jnp.float32)
    w2s = jnp.zeros((p, out_pad), jnp.float32)
    for g in range(ngroups):
        w1p = w1p.at[g * hid:(g + 1) * hid, g * hid:(g + 1) * hid].set(w1)
        w2s = w2s.at[g * hid:(g + 1) * hid, :out_dim].set(w2)
    b2p = jnp.zeros((1, out_pad), jnp.float32).at[:, :out_dim].set(b2)

    return {
        "c_feat": cf, "hid": hid, "ngroups": ngroups, "out_dim": out_dim,
        "enc_w": enc_w_p.astype(jnp.bfloat16), "enc_b": enc_b_p,
        "w0_feat": w0_feat.astype(jnp.bfloat16),
        "w0rel": w0rel, "b0": b0p,
        "w1": w1p.astype(jnp.bfloat16), "b1": b1p,
        "w2": w2s.astype(jnp.bfloat16), "b2": b2p,
    }


def liif_forward(params, inp, coord, cell, local_ensemble=True, feat_unfold=True,
                 cell_decode=True, query_tile_rows=256):
    cf, hid, ngroups = params["c_feat"], params["hid"], params["ngroups"]
    hid_pad = params["w0_feat"].shape[1]
    feat = conv3x3_encoder(inp, params["enc_w"], params["enc_b"], cf)   # (B,Cf,H,W) bf16
    B, _, H, W = feat.shape
    feat_u = unfold3x3(feat) if feat_unfold else feat                   # (B,Cu,H,W)
    Cu = feat_u.shape[1]

    if local_ensemble:
        vx_lst, vy_lst, eps = [-1, 1], [-1, 1], 1e-6
    else:
        vx_lst, vy_lst, eps = [0], [0], 0.0
    rx = 2.0 / H / 2.0
    ry = 2.0 / W / 2.0
    scale = jnp.array([H, W], jnp.float32)

    bs, q = coord.shape[:2]
    zero_bias = jnp.zeros((1, hid_pad), jnp.float32)

    outs = []
    for bi in range(bs):
        coord_b, cell_b = coord[bi], cell[bi]
        # Pre-project the (tiny) unfolded feature map through imnet layer-0's
        # q_feat rows once per image; the per-query gather becomes a cheap
        # wrapper-side jnp.take streamed into the kernel as a bf16 BlockSpec input.
        feat_flat = feat_u[bi].reshape(Cu, H * W).T.astype(jnp.bfloat16)       # (HW,Cu)
        feat_w0 = pallas_linear(feat_flat, params["w0_feat"], zero_bias,
                                tile_rows=128, out_dtype=jnp.bfloat16)[:, :hid]  # (HW,hid)

        rel_cell = (cell_b * scale) if cell_decode else jnp.zeros_like(cell_b)
        idx_cols, rel_y_cols, rel_x_cols, area_cols = [], [], [], []
        for vx in vx_lst:
            for vy in vy_lst:
                shift = jnp.array([vx * rx + eps, vy * ry + eps], jnp.float32)
                c = jnp.clip(coord_b + shift, -1.0 + 1e-6, 1.0 - 1e-6)
                # nearest-neighbor indices (grid_sample align_corners=False)
                iy = jnp.clip(jnp.round(((c[:, 0] + 1.0) * H - 1.0) / 2.0)
                              .astype(jnp.int32), 0, H - 1)
                ix = jnp.clip(jnp.round(((c[:, 1] + 1.0) * W - 1.0) / 2.0)
                              .astype(jnp.int32), 0, W - 1)
                q_coord = jnp.stack(
                    [-1.0 + (2.0 * iy.astype(jnp.float32) + 1.0) / H,
                     -1.0 + (2.0 * ix.astype(jnp.float32) + 1.0) / W], axis=-1)
                rel = (coord_b - q_coord) * scale
                idx_cols.append(iy * W + ix)
                rel_y_cols.append(rel[:, 0])
                rel_x_cols.append(rel[:, 1])
                area_cols.append(jnp.abs(rel[:, 0] * rel[:, 1]) + 1e-9)

        tot_area = sum(area_cols)
        if local_ensemble:
            area_cols[0], area_cols[3] = area_cols[3], area_cols[0]
            area_cols[1], area_cols[2] = area_cols[2], area_cols[1]
        wgt_cols = [a / tot_area for a in area_cols]

        # pad to ngroups branch slots (padded branches have weight 0 -> no effect)
        zq_f = jnp.zeros((q,), jnp.float32)
        zq_i = jnp.zeros((q,), jnp.int32)
        while len(idx_cols) < ngroups:
            idx_cols.append(zq_i)
            rel_y_cols.append(zq_f)
            rel_x_cols.append(zq_f)
            wgt_cols.append(zq_f)

        idx = jnp.stack(idx_cols, axis=-1).astype(jnp.int32)                  # (Q, ng)
        gathered = jnp.take(feat_w0, idx, axis=0).reshape(q, ngroups * hid)   # (Q, P) bf16
        meta = jnp.stack(rel_y_cols + rel_x_cols + wgt_cols
                         + [rel_cell[:, 0], rel_cell[:, 1]], axis=-1)         # (Q, 3ng+2)

        outs.append(pallas_liif_query(
            gathered, meta, params["w0rel"], params["b0"], params["w1"],
            params["b1"], params["w2"], params["b2"],
            ngroups=ngroups, hid=hid, tile_rows=query_tile_rows,
            out_dim=params["out_dim"]))
    return jnp.stack(outs, axis=0)                                            # (B, Q, 3)


# ------------------------- pure-JAX f32 reference --------------------------- #

def liif_forward_ref(raw, inp, coord, cell, local_ensemble=True, feat_unfold=True,
                     cell_decode=True):
    enc_w, enc_b = raw["enc_w"], raw["enc_b"]
    w0, b0, w1, b1, w2, b2 = raw["imnet"]
    B, Cin, H0, W0 = inp.shape
    patches = unfold3x3(inp).transpose(0, 2, 3, 1).reshape(B * H0 * W0, Cin * 9)
    feat = (patches @ enc_w + enc_b).reshape(B, H0, W0, -1).transpose(0, 3, 1, 2)
    if feat_unfold:
        feat = unfold3x3(feat)
    _, _, H, W = feat.shape
    if local_ensemble:
        vx_lst, vy_lst, eps = [-1, 1], [-1, 1], 1e-6
    else:
        vx_lst, vy_lst, eps = [0], [0], 0.0
    rx, ry = 2.0 / H / 2.0, 2.0 / W / 2.0
    scale = jnp.array([H, W], jnp.float32)
    preds, areas = [], []
    for vx in vx_lst:
        for vy in vy_lst:
            shift = jnp.array([vx * rx + eps, vy * ry + eps], jnp.float32)
            c = jnp.clip(coord + shift, -1.0 + 1e-6, 1.0 - 1e-6)
            iy = jnp.clip(jnp.round(((c[..., 0] + 1.0) * H - 1.0) / 2.0)
                          .astype(jnp.int32), 0, H - 1)
            ix = jnp.clip(jnp.round(((c[..., 1] + 1.0) * W - 1.0) / 2.0)
                          .astype(jnp.int32), 0, W - 1)
            q_feat = jax.vmap(lambda f, yy, xx: f[:, yy, xx].T)(feat, iy, ix)
            q_coord = jnp.stack([-1.0 + (2.0 * iy.astype(jnp.float32) + 1.0) / H,
                                 -1.0 + (2.0 * ix.astype(jnp.float32) + 1.0) / W], -1)
            rel = (coord - q_coord) * scale
            x = jnp.concatenate([q_feat, rel], -1)
            if cell_decode:
                x = jnp.concatenate([x, cell * scale], -1)
            h = jnp.maximum(x @ w0 + b0, 0.0)
            h = jnp.maximum(h @ w1 + b1, 0.0)
            preds.append(h @ w2 + b2)
            areas.append(jnp.abs(rel[..., 0] * rel[..., 1]) + 1e-9)
    tot = sum(areas)
    if local_ensemble:
        areas[0], areas[3] = areas[3], areas[0]
        areas[1], areas[2] = areas[2], areas[1]
    ret = 0.0
    for p, a in zip(preds, areas):
        ret = ret + p * (a / tot)[..., None]
    return ret


# ----------------------------------- main ----------------------------------- #

if __name__ == "__main__":
    key = jax.random.PRNGKey(0)
    ks = jax.random.split(key, 8)

    B, C_in, H, W = 1, 3, 16, 16
    C_feat, hidden, Q = 8, 64, 1024          # Q=1024, tile=256 -> 4-deep grid
    D_in = C_feat * 9 + 2 + 2                # feat_unfold + rel_coord + rel_cell

    raw = {
        "enc_w": jax.random.normal(ks[0], (C_in * 9, C_feat), jnp.float32) * 0.1,
        "enc_b": jax.random.normal(ks[1], (1, C_feat), jnp.float32) * 0.01,
        "imnet": (
            jax.random.normal(ks[2], (D_in, hidden), jnp.float32) * 0.1,
            jnp.zeros((1, hidden), jnp.float32),
            jax.random.normal(ks[3], (hidden, hidden), jnp.float32) * 0.1,
            jnp.zeros((1, hidden), jnp.float32),
            jax.random.normal(ks[4], (hidden, 3), jnp.float32) * 0.1,
            jnp.zeros((1, 3), jnp.float32),
        ),
    }
    params = prepare_liif_params(raw, local_ensemble=True, feat_unfold=True,
                                 cell_decode=True)

    inp = jax.random.normal(ks[5], (B, C_in, H, W), jnp.float32)
    coord = jax.random.uniform(ks[6], (B, Q, 2), jnp.float32, -1.0, 1.0)
    cell = jnp.full((B, Q, 2), 2.0 / 32.0, jnp.float32)   # target resolution 32x32

    out = jax.block_until_ready(liif_forward(params, inp, coord, cell))
    assert out.shape == (B, Q, 3) and out.dtype == jnp.float32

    # sanity check vs plain-JAX f32 reference (bf16 MXU operands -> loose tolerance)
    ref = liif_forward_ref(raw, inp, coord, cell)
    err = float(jnp.max(jnp.abs(out - ref)))
    assert err < 5e-2, f"max abs err {err}"

    print("KERNEL_OK")
</pallas_src>

<mosaic_0001>
module attributes {stable_mosaic.version = 11 : i64} {
  func.func @_linear_kernel(%arg0: i32, %arg1: memref<128x27xbf16, #tpu.memory_space<vmem>>, %arg2: memref<27x128xbf16, #tpu.memory_space<vmem>>, %arg3: memref<1x128xf32, #tpu.memory_space<vmem>>, %arg4: memref<128x128xbf16, #tpu.memory_space<vmem>>) attributes {dimension_semantics = [#tpu.dimension_semantics<parallel>], iteration_bounds = array<i64: 2>, scalar_prefetch = 0 : i64, scratch_operands = 0 : i64, tpu.core_type = #tpu.core_type<tc>, window_params = [{transform_indices = @transform_0, window_bounds = array<i64: 128, 27>}, {pipeline_mode = #tpu.pipeline_mode<synchronous>, transform_indices = @transform_1, window_bounds = array<i64: 27, 128>}, {pipeline_mode = #tpu.pipeline_mode<synchronous>, transform_indices = @transform_2, window_bounds = array<i64: 1, 128>}, {transform_indices = @transform_3, window_bounds = array<i64: 128, 128>}]} {
    %c0 = arith.constant 0 : index
    %c0_0 = arith.constant 0 : index
    %0 = vector.load %arg1[%c0, %c0_0] : memref<128x27xbf16, #tpu.memory_space<vmem>>, vector<128x27xbf16>
    %c0_1 = arith.constant 0 : index
    %c0_2 = arith.constant 0 : index
    %1 = vector.load %arg2[%c0_1, %c0_2] : memref<27x128xbf16, #tpu.memory_space<vmem>>, vector<27x128xbf16>
    %cst = arith.constant dense<0.000000e+00> : vector<128x128xf32>
    %2 = tpu.matmul %0, %1, %cst {dimension_numbers = #tpu.dot_dimension_numbers<[1], [0], [0], [1], [0, 0, 1, 1], [], []>} : vector<128x27xbf16>, vector<27x128xbf16>, vector<128x128xf32> -> vector<128x128xf32>
    %c0_3 = arith.constant 0 : index
    %c0_4 = arith.constant 0 : index
    %3 = vector.load %arg3[%c0_3, %c0_4] : memref<1x128xf32, #tpu.memory_space<vmem>>, vector<1x128xf32>
    %4 = vector.broadcast %3 : vector<1x128xf32> to vector<128x128xf32>
    %5 = arith.addf %2, %4 : vector<128x128xf32>
    %6 = arith.truncf %5 : vector<128x128xf32> to vector<128x128xbf16>
    %c0_5 = arith.constant 0 : index
    %c0_6 = arith.constant 0 : index
    %7 = vector.load %arg4[%c0_5, %c0_6] : memref<128x128xbf16, #tpu.memory_space<vmem>>, vector<128x128xbf16>
    tpu.vector_store %arg4[%c0_5, %c0_6], %6 {strides = array<i32>} : memref<128x128xbf16, #tpu.memory_space<vmem>>, vector<128x128xbf16>,
    return
  }
  func.func @transform_0(%arg0: i32) -> (i32, i32) {
    %c0_i32 = arith.constant 0 : i32
    %c0_i32_0 = arith.constant 0 : i32
    return %arg0, %c0_i32 : i32, i32
  }
  func.func @transform_1(%arg0: i32) -> (i32, i32) {
    %c0_i32 = arith.constant 0 : i32
    %c0_i32_0 = arith.constant 0 : i32
    %c0_i32_1 = arith.constant 0 : i32
    return %c0_i32, %c0_i32_0 : i32, i32
  }
  func.func @transform_2(%arg0: i32) -> (i32, i32) {
    %c0_i32 = arith.constant 0 : i32
    %c0_i32_0 = arith.constant 0 : i32
    %c0_i32_1 = arith.constant 0 : i32
    return %c0_i32, %c0_i32_0 : i32, i32
  }
  func.func @transform_3(%arg0: i32) -> (i32, i32) {
    %c0_i32 = arith.constant 0 : i32
    %c0_i32_0 = arith.constant 0 : i32
    return %arg0, %c0_i32 : i32, i32
  }
}

</mosaic_0001>

<bundles_post_ra>
// kernel: tpu_custom_call.1
= control target key start
LH: loop header
LB: loop body
LE: loop exit
PB: predicated region body
PF: predicated region fallthrough
CT: control target
= control target key end

     0   :  { %8 = vsyncpa [#allocation3], 0  ;;  %s812_s0 = inlined_call_operand.vmem [shape: bf16[256,27], index: 0, kind: input, shape index: {}]   ;;  %s813_s1 = inlined_call_operand.vmem [shape: bf16[27,128], index: 1, kind: input, shape index: {}]   ;;  %s814_s2 = inlined_call_operand.vmem [shape: f32[1,128], index: 2, kind: input, shape index: {}]   ;;  %s815_s3 = inlined_call_operand.hbm [shape: bf16[256,128], index: 3, kind: output, shape index: {}]  }
   0x1   :  { %10 = vsyncpa [#allocation3 + $0x1], 0  ;;  %s693_s12 = smov 0   ;;  %s695_s13 = smov 0  }
   0x2   :  { %s697_s14 = smov 0   ;;  %s699_s15 = smov 0  }
   0x3 LB: > { %s714_s16 = sadd.s32 4294967295, %s668_s15   ;;  %s439_s17 = sadd.s32 4294967294, %s668_s15   ;;  %s668_s15 = sphi %s699_s15, %s821_s15   ;;  %s664_s14 = sphi %s697_s14, %s820_s14   ;;  %s660_s13 = sphi %s695_s13, %s819_s13   ;;  %s656_s12 = sphi %s693_s12, %s818_s12  }
   0x4   : > { %s718_s18 = sadd.s32 1, %s668_s15   ;;  %s91_s19 = sadd.s32 1, %s664_s14 }
   0x5   : > { %s88_s20 = ssub.s32 %s668_s15, %s718_s18  ;;  %p101_p0 = scmp.ne.s32.totalorder %s664_s14, %s660_s13 }
   0x6   : > { %p89_p1 = scmp.eq.s32.totalorder %s88_s20, 0  ;;  %p102_p2 = scmp.eq.s32.totalorder %s714_s16, 1 }
   0x7   : > { %p107_p3 = scmp.ne.s32.totalorder %s660_s13, %s656_s12  ;;  %p108_p4 = scmp.eq.s32.totalorder %s439_s17, 1 }
   0x8   : > { %s729_s21 = scalar_select %p89_p1, %s664_s14, %s91_s19  }
   0x9   : > { %p731_p5 = por %p102_p2, %p101_p0  ;;  %p735_p6 = por %p108_p4, %p107_p3 }
   0xa   : > { %p442_p7 = scmp.ge.s32.totalorder %s668_s15, 1  ;;  %p141_p8 = scmp.lt.s32.totalorder %s668_s15, 3 }
   0xc   : > { %p142_p9 = pnand %p442_p7, %p141_p8 }
   0xd   : > { %s444_s28 = sshll.u32 (!%p142_p9), %s714_s16, 4  ;;  %s162_s8 = sand.u32 (!%p142_p9), 1, %s660_s13  }
   0xe   : > { %145 = sbr.rel (%p142_p9) target bundleno = 198 (0xc6), region = 32  ;;  %p166_p10 = scmp.lt.s32.totalorder (!%p142_p9), %s444_s28, 31 }
   0xf   : > { %s443_s11 = sshll.u32 (!%p142_p9), %s162_s8, 6  ;;  %s509_s19 = sshll.u32 (!%p142_p9), %s714_s16, 6 }
  0x10   : > { %s768_s17 = scalar_lea.vmem (!%p142_p9), [#allocation2], %s443_s11  ;;  %s373_s25 = scalar_lea.hbm (!%p142_p9), %s815_s3, %s509_s19 }
  0x11   : > { %s374_s26 = sshll.u32 (!%p142_p9), %s768_s17, 4  ;;  %s376_s27 = sshll.u32 (!%p142_p9), %s373_s25, 4  ;;  %s375_s26 = int_to_ptr.vmem [resolvable:$true] %s374_s26  ;;  %s377_s27 = int_to_ptr.hbm [resolvable:$true] %s376_s27 }
  0x12   : > { %s362_s16 = scalar_lea.sflag (!%p142_p9), [#allocation3], %s162_s8  ;;  %s626_s5 = scalar_lea.hbm (!%p142_p9), %s815_s3, 128 }
  0x13   : > { %v484_v0 = vld [vmem:[%s813_s1 + $0x8] sm:$0xf]  ;;  %v508_v1 = vld [vmem:[%s813_s1 + $0x8] sm:$0x30]  ;;  %vm273_vm0 = vcmask 1044480   ;;  %vm274_vm1 = vcmask 1045504  }
  0x14   : > { %v485_v2 = vor.u32 %v508_v1, %v484_v0  ;;  %v670_v3 = vmov 65535   ;;  %s823_s28 = smov (!%p166_p10, %s444_s28), 31  ;;  %v507_v7 = vld [vmem:[%s813_s1] sm:$0xff]  ;;  %vm248_vm2 = vcmask 220160  }
  0x15   : > { %v275_v4 = vsel %vm273_vm0, 4294967295, %v670_v3  ;;  %s445_s4 = sshll.u32 %s823_s28, 2  ;;  %v605_v18 = vld [vmem:[%s814_s2] ss:$0 sm:$0xff]  ;;  %s620_s28 = sshra.s32 %s377_s27, 4  ;;  %s621_s28 = int_to_ptr.hbm [resolvable:$true] %s620_s28 }
  0x16   : > { %v276_v5 = vsel %vm274_vm1, %v275_v4, 0  ;;  %s169_s7 = scalar_lea.vmem %s812_s0, %s445_s4  ;;  %s622_s29 = scalar_lea.hbm %s621_s28, 64 }
  0x17   : > { %v278_v6 = vand.u32 %v485_v2, %v276_v5  ;;  %v499_v8 = vld [vmem:[%s169_s7] sm:$0xff]  ;;  %v501_v9 = vld [vmem:[%s169_s7 + $0x10] sm:$0xff]  ;;  %v500_v12 = vld [vmem:[%s169_s7 + $0x8] sm:$0xff]  ;;  %p623_p11 = scmp.ne.s32.totalorder %s621_s28, %s622_s29  ;;  %p627_p0 = scmp.lt.s32.totalorder %s621_s28, %s815_s3 }
  0x18   : > { %v503_v10 = vld [vmem:[%s169_s7 + $0x20] sm:$0xff]  ;;  %v505_v11 = vld [vmem:[%s169_s7 + $0x30] sm:$0xff]  ;;  %v502_v13 = vld [vmem:[%s169_s7 + $0x18] sm:$0xff]  ;;  %p628_p1 = scmp.lt.s32.totalorder %s626_s5, %s622_s29 }
  0x19   : > { %286 = vmatpush.bf16.msra.mxu0 %v278_v6  ;;  %557 = vmatpush.bf16.msra.mxu1 %v278_v6  ;;  %v504_v14 = vld [vmem:[%s169_s7 + $0x28] sm:$0xff]  ;;  %v506_v15 = vld [vmem:[%s169_s7 + $0x38] sm:$0xff]  ;;  %p624_p12 = pnand %p623_p11, %p731_p5 }
  0x1a   : > { %558 = vmatpush.bf16.msra.mxu2 %v278_v6  ;;  %559 = vmatpush.bf16.msra.mxu3 %v278_v6  ;;  %p629_p2 = por %p628_p1, %p627_p0 }
  0x1b   : > { %p625_p13 = pneg %p624_p12 }
  0x1d   : > { %287 = vmatpush.bf16.msra.mxu0 %v507_v7  ;;  %560 = vmatpush.bf16.msra.mxu1 %v507_v7  ;;  %p630_p3 = pnand %p629_p2, %p625_p13 }
  0x1e   : > { %561 = vmatpush.bf16.msra.mxu2 %v507_v7  ;;  %562 = vmatpush.bf16.msra.mxu3 %v507_v7 }
  0x20   : > { %486 = vmatmul.msk.bf16.vlgmr.msra.gmra.mxu0 %vm248_vm2, %v499_v8  ;;  %488 = vmatmul.msk.bf16.vlgmr.msra.gmra.mxu1 %vm248_vm2, %v501_v9 }
  0x21   : > { %490 = vmatmul.msk.bf16.vlgmr.msra.gmra.mxu2 %vm248_vm2, %v503_v10  ;;  %492 = vmatmul.msk.bf16.vlgmr.msra.gmra.mxu3 %vm248_vm2, %v505_v11 }
  0x30   : > { %487 = vmatmul.msk.bf16.gmra.mxu0 %vm248_vm2, %v500_v12  ;;  %489 = vmatmul.msk.bf16.gmra.mxu1 %vm248_vm2, %v502_v13 }
  0x31   : > { %491 = vmatmul.msk.bf16.gmra.mxu2 %vm248_vm2, %v504_v14  ;;  %493 = vmatmul.msk.bf16.gmra.mxu3 %vm248_vm2, %v506_v15 }
  0x9d   : > { %v289_v16 = vpop.f32.mrf.mxu0  ;;  %v299_v17 = vpop.f32.mrf.mxu1 }
  0x9e   : > { %v290_v23 = vadd.f32 %v605_v18, %v289_v16  ;;  %v300_v24 = vadd.f32 %v605_v18, %v299_v17 }
  0xa4   : > { %v309_v19 = vpop.f32.mrf.mxu2  ;;  %v319_v20 = vpop.f32.mrf.mxu3 }
  0xa5   : > { %v291_v21 = vpop.f32.mrf.mxu0  ;;  %v301_v22 = vpop.f32.mrf.mxu1  ;;  %v310_v31 = vadd.f32 %v605_v18, %v309_v19  ;;  %v320_v32 = vadd.f32 %v605_v18, %v319_v20 }
  0xa6   : > { %v292_v25 = vadd.f32 %v605_v18, %v291_v21  ;;  %v302_v26 = vadd.f32 %v605_v18, %v301_v22 }
  0xa8   : > { %v513_v27 = vpack.c.bf16 %v292_v25, %v290_v23  ;;  %v523_v28 = vpack.c.bf16 %v302_v26, %v300_v24 }
  0xaa   : > { %514 = vst [vmem:[%s768_s17] sm:$0xff] %v513_v27  }
  0xab   : > { %551 = vst [vmem:[%s768_s17 + $0x10] sm:$0xff] %v523_v28  }
  0xac   : > { %v311_v29 = vpop.f32.mrf.mxu2  ;;  %v321_v30 = vpop.f32.mrf.mxu3 }
  0xad   : > { %v312_v33 = vadd.f32 %v605_v18, %v311_v29  ;;  %v322_v34 = vadd.f32 %v605_v18, %v321_v30  ;;  %v294_v35 = vpop.f32.mrf.mxu0  ;;  %v304_v36 = vpop.f32.mrf.mxu1 }
  0xae   : > { %v295_v43 = vadd.f32 %v605_v18, %v294_v35  ;;  %v305_v44 = vadd.f32 %v605_v18, %v304_v36 }
  0xaf   : > { %v533_v37 = vpack.c.bf16 %v312_v33, %v310_v31  ;;  %v543_v38 = vpack.c.bf16 %v322_v34, %v320_v32 }
  0xb1   : > { %553 = vst [vmem:[%s768_s17 + $0x20] sm:$0xff] %v533_v37  }
  0xb2   : > { %555 = vst [vmem:[%s768_s17 + $0x30] sm:$0xff] %v543_v38  }
  0xb4   : > { %v314_v39 = vpop.f32.mrf.mxu2  ;;  %v324_v40 = vpop.f32.mrf.mxu3 }
  0xb5   : > { %v296_v41 = vpop.f32.mrf.mxu0  ;;  %v306_v42 = vpop.f32.mrf.mxu1  ;;  %v315_v51 = vadd.f32 %v605_v18, %v314_v39  ;;  %v325_v52 = vadd.f32 %v605_v18, %v324_v40 }
  0xb6   : > { %v297_v45 = vadd.f32 %v605_v18, %v296_v41  ;;  %v307_v46 = vadd.f32 %v605_v18, %v306_v42 }
  0xb8   : > { %v518_v47 = vpack.c.bf16 %v297_v45, %v295_v43  ;;  %v528_v48 = vpack.c.bf16 %v307_v46, %v305_v44 }
  0xba   : > { %550 = vst [vmem:[%s768_s17 + $0x8] sm:$0xff] %v518_v47  }
  0xbb   : > { %552 = vst [vmem:[%s768_s17 + $0x18] sm:$0xff] %v528_v48  }
  0xbc   : > { %v316_v49 = vpop.f32.mrf.mxu2  ;;  %v326_v50 = vpop.f32.mrf.mxu3 }
  0xbd   : > { %v317_v53 = vadd.f32 %v605_v18, %v316_v49  ;;  %v327_v54 = vadd.f32 %v605_v18, %v326_v50 }
  0xbf   : > { %v538_v55 = vpack.c.bf16 %v317_v53, %v315_v51  ;;  %v548_v56 = vpack.c.bf16 %v327_v54, %v325_v52 }
  0xc1   : > { %554 = vst [vmem:[%s768_s17 + $0x28] sm:$0xff] %v538_v55  }
  0xc2   : > { %556 = vst [vmem:[%s768_s17 + $0x38] sm:$0xff] %v548_v56  }
  0xc3   : > { %633 = shalt.err (!%p630_p3)
}
  0xc4   : > { %s671_s8 = smov 64   ;;  %s672_s9 = smov 4  }
  0xc5   : > { %563 = dma.vmem_to_hbm [thread:$0]  (%p731_p5), %s375_s26, 1024, %s377_s27, %s362_s16, %s671_s8, %s671_s8, %s672_s9  }
  0xc6 PF: > { %p569_p4 = scmp.ge.s32.totalorder %s668_s15, 2  ;;  %s391_s10 = sand.u32 1, %s656_s12  }
  0xc7   : > { %s392_s11 = scalar_lea.sflag [#allocation3], %s391_s10 }
  0xc8   : > { %p566_p7 = pnand %p569_p4, %p735_p6 }
  0xca   : > { %p567_p8 = pneg %p566_p7 }
  0xcc   : > { %651 = dma.done.wait (%p567_p8), %s392_s11, 1024  }
  0xcd   : > { %653 = vsyncadd (%p567_p8), %s392_s11, 4294966272  ;;  %p13_p9 = scmp.ge.s32.totalorder %s718_s18, 4   ;;  %s818_s12 = smov %s660_s13 }
  0xce   : > { %s819_s13 = smov %s664_s14  ;;  %s820_s14 = smov %s729_s21 }
  0xcf   : > { %s821_s15 = smov %s718_s18  ;;  %15 = sbr.rel (!%p13_p9) target bundleno = 3 (0x3), region = 67 }
  0xd4   :  { %398 = vsyncpa [#allocation3], 1 }
  0xd5   :  { %400 = vsyncpa [#allocation3 + $0x1], 1 }

</bundles_post_ra>
